<compile_context>
chip_gen: v7x
topology: tpu7x:2x2x1
jax: 0.10.0
libtpu: 0.0.40
codegen_flags: <defaults>
</compile_context>

<pallas_src>
import functools

import jax
import jax.numpy as jnp
from jax import lax
from jax.experimental import pallas as pl
from jax.experimental.pallas import tpu as pltpu

_EPS = 1e-07


def _normalize_kernel(x_ref, o_ref, *, power):
    # x_ref: (1, C, TL) tile of the (M, C, L) view; reduce over C (sublane axis, XLU).
    x = x_ref[...].astype(jnp.float32)
    xp = x + _EPS
    if power == 2:
        s = jnp.sum(xp * xp, axis=1, keepdims=True)           # (1, 1, TL)
        inv_norm = lax.rsqrt(s)                                # EUP, no divide
    elif power == 1:
        s = jnp.sum(xp, axis=1, keepdims=True)
        inv_norm = pl.reciprocal(s, approx=False)
    else:
        s = jnp.sum(xp ** power, axis=1, keepdims=True)
        inv_norm = s ** (-1.0 / power)
    o_ref[...] = (x * inv_norm).astype(o_ref.dtype)


def _pick_lane_tile(L, C, elt_bytes):
    """Largest multiple of 128 that divides L while keeping the per-block f32 working
    set around <= 4 MiB; falls back to the full extent when L is not 128-aligned."""
    if L % 128 != 0:
        # TODO(synk): non-128-aligned trailing extents (e.g. 2-D inputs with L == 1) use
        # one block over the whole lane extent; correct but not lane-dense.
        return L
    # Budget the f32 copy of the block at ~4 MiB (input tile itself is <= that).
    budget_elems = (4 * 1024 * 1024) // 4
    max_tl = max(128, budget_elems // max(C, 1))
    t = min(L, 2048, max_tl)
    t -= t % 128
    while t >= 128:
        if L % t == 0:
            return t
        t -= 128
    return L


def normalize_forward(x, power=2, dim=1):
    """Pallas implementation of Normalize.forward: x / ||x + eps||_p along `dim`."""
    if dim < 0:
        dim += x.ndim
    shape = x.shape
    C = shape[dim]
    M = 1
    for s in shape[:dim]:
        M *= s
    L = 1
    for s in shape[dim + 1:]:
        L *= s
    x3 = x.reshape(M, C, L)

    elt = jnp.dtype(x.dtype).itemsize
    TL = _pick_lane_tile(L, C, elt)
    grid = (M, L // TL)

    block_bytes = C * TL * elt
    # double-buffered in + out blocks, plus in-kernel f32 temporaries, with headroom.
    vmem_need = 4 * block_bytes + 4 * C * TL * 4
    vmem_limit = int(min(max(2 * vmem_need, 16 * 1024 * 1024), 64 * 1024 * 1024))

    total = M * C * L
    cost = pl.CostEstimate(
        flops=3 * total,
        transcendentals=M * L,
        bytes_accessed=2 * total * elt,
    )

    out = pl.pallas_call(
        functools.partial(_normalize_kernel, power=power),
        out_shape=jax.ShapeDtypeStruct((M, C, L), x.dtype),
        grid_spec=pltpu.PrefetchScalarGridSpec(
            num_scalar_prefetch=0,
            grid=grid,
            in_specs=[pl.BlockSpec((1, C, TL), lambda m, l: (m, 0, l))],
            out_specs=pl.BlockSpec((1, C, TL), lambda m, l: (m, 0, l)),
        ),
        compiler_params=pltpu.CompilerParams(
            dimension_semantics=("parallel", "parallel"),
            vmem_limit_bytes=vmem_limit,
        ),
        cost_estimate=cost,
    )(x3)
    return out.reshape(shape)


def _normalize_ref(x, power=2, dim=1):
    # Pure-JAX reference matching the PyTorch module exactly.
    xp = x + _EPS
    norm = jnp.sum(xp ** power, axis=dim, keepdims=True) ** (1.0 / power)
    return x / norm


if __name__ == "__main__":
    key = jax.random.PRNGKey(0)
    N, C, H, W = 2, 4, 16, 16
    x = jax.random.normal(key, (N, C, H, W), dtype=jnp.float32)

    out = normalize_forward(x, power=2, dim=1)
    out = jax.block_until_ready(out)

    ref = _normalize_ref(x, power=2, dim=1)
    assert out.shape == (N, C, H, W)
    assert jnp.allclose(out, ref, atol=1e-5, rtol=1e-5)

    print("KERNEL_OK")
</pallas_src>

<mosaic_0001>
module attributes {stable_mosaic.version = 11 : i64} {
  func.func @_normalize_kernel(%arg0: i32, %arg1: i32, %arg2: memref<1x4x256xf32, #tpu.memory_space<vmem>>, %arg3: memref<1x4x256xf32, #tpu.memory_space<vmem>>) attributes {dimension_semantics = [#tpu.dimension_semantics<parallel>, #tpu.dimension_semantics<parallel>], iteration_bounds = array<i64: 2, 1>, scalar_prefetch = 0 : i64, scratch_operands = 0 : i64, tpu.core_type = #tpu.core_type<tc>, window_params = [{transform_indices = @transform_0, window_bounds = array<i64: 1, 4, 256>}, {transform_indices = @transform_1, window_bounds = array<i64: 1, 4, 256>}]} {
    %c0 = arith.constant 0 : index
    %c0_0 = arith.constant 0 : index
    %c0_1 = arith.constant 0 : index
    %0 = vector.load %arg2[%c0, %c0_0, %c0_1] : memref<1x4x256xf32, #tpu.memory_space<vmem>>, vector<1x4x256xf32>
    %cst = arith.constant 1.000000e-07 : f32
    %1 = vector.broadcast %cst : f32 to vector<1x4x256xf32>
    %2 = arith.addf %0, %1 : vector<1x4x256xf32>
    %3 = arith.mulf %2, %2 : vector<1x4x256xf32>
    %cst_2 = arith.constant dense<0.000000e+00> : vector<1x256xf32>
    %4 = vector.multi_reduction <add>, %3, %cst_2 [1] : vector<1x4x256xf32> to vector<1x256xf32>
    %5 = vector.shape_cast %4 : vector<1x256xf32> to vector<1x1x256xf32>
    %6 = math.rsqrt %5 : vector<1x1x256xf32>
    %7 = vector.broadcast %6 : vector<1x1x256xf32> to vector<1x4x256xf32>
    %8 = arith.mulf %0, %7 : vector<1x4x256xf32>
    %c0_3 = arith.constant 0 : index
    %c0_4 = arith.constant 0 : index
    %c0_5 = arith.constant 0 : index
    %9 = vector.load %arg3[%c0_3, %c0_4, %c0_5] : memref<1x4x256xf32, #tpu.memory_space<vmem>>, vector<1x4x256xf32>
    tpu.vector_store %arg3[%c0_3, %c0_4, %c0_5], %8 {strides = array<i32>} : memref<1x4x256xf32, #tpu.memory_space<vmem>>, vector<1x4x256xf32>,
    return
  }
  func.func @transform_0(%arg0: i32, %arg1: i32) -> (i32, i32, i32) {
    %c0_i32 = arith.constant 0 : i32
    %c0_i32_0 = arith.constant 0 : i32
    return %arg0, %c0_i32, %arg1 : i32, i32, i32
  }
  func.func @transform_1(%arg0: i32, %arg1: i32) -> (i32, i32, i32) {
    %c0_i32 = arith.constant 0 : i32
    %c0_i32_0 = arith.constant 0 : i32
    return %arg0, %c0_i32, %arg1 : i32, i32, i32
  }
}

</mosaic_0001>

<bundles_post_ra>
// kernel: tpu_custom_call.1
= control target key start
LH: loop header
LB: loop body
LE: loop exit
PB: predicated region body
PF: predicated region fallthrough
CT: control target
= control target key end

     0   :  { %6 = vsyncpa [#allocation3], 0  ;;  %s664_s0 = inlined_call_operand.hbm [shape: f32[2,4,256], index: 0, kind: input, shape index: {}]   ;;  %s665_s1 = inlined_call_operand.hbm [shape: f32[2,4,256], index: 1, kind: output, shape index: {}]  }
   0x1   :  { %8 = vsyncpa [#allocation3 + $0x1], 0 }
   0x2   :  { %9 = vsyncpa [#allocation4], 0 }
   0x3   :  { %11 = vsyncpa [#allocation4 + $0x1], 0  ;;  %s492_s6 = smov 0   ;;  %s494_s7 = smov 0  }
   0x4   :  { %s496_s8 = smov 0   ;;  %s498_s9 = smov 0  }
   0x5   :  { %s500_s10 = smov 0   ;;  %s502_s11 = smov 0  }
   0x6 LB: > { %s283_s12 = sadd.s32 4294967295, %s478_s11   ;;  %s284_s13 = sadd.s32 4294967294, %s478_s11   ;;  %s478_s11 = sphi %s502_s11, %s17_s11   ;;  %s474_s10 = sphi %s500_s10, %s681_s10   ;;  %s470_s9 = sphi %s498_s9, %s680_s9   ;;  %s466_s8 = sphi %s496_s8, %s679_s8   ;;  %s462_s7 = sphi %s494_s7, %s678_s7   ;;  %s458_s6 = sphi %s492_s6, %s677_s6  }
   0x7   : > { %s29_s14 = sadd.s32 1, %s474_s10  ;;  %s38_s15 = sadd.s32 1, %s466_s8 }
   0x8   : > { %p31_p0 = scmp.ge.s32.totalorder %s29_s14, 2  ;;  %p45_p1 = scmp.ne.s32.totalorder %s466_s8, %s462_s7 }
   0x9   : > { %p46_p2 = scmp.eq.s32.totalorder %s478_s11, 0  ;;  %p51_p3 = scmp.ne.s32.totalorder %s462_s7, %s458_s6 }
   0xa   : > { %s683_s14 = smov (%p31_p0, %s29_s14), 0  ;;  %p52_p5 = scmp.eq.s32.totalorder %s283_s12, 0 }
   0xb   : > { %p533_p4 = por %p46_p2, %p45_p1  ;;  %s33_s17 = ssub.s32 %s474_s10, %s683_s14 }
   0xc   : > { %p77_p6 = scmp.eq.s32.totalorder %s283_s12, 1  ;;  %p36_p7 = scmp.eq.s32.totalorder %s33_s17, 0 }
   0xd   : > { %p539_p8 = por %p52_p5, %p51_p3  ;;  %p83_p10 = scmp.eq.s32.totalorder %s284_s13, 1 }
   0xe   : > { %p543_p9 = por %p77_p6, %p45_p1  ;;  %p312_p13 = scmp.lt.s32.totalorder %s478_s11, 2 }
   0xf   : > { %s548_s20 = scalar_select %p36_p7, %s466_s8, %s38_s15  }
  0x10   : > { %s669_s19 = scalar_select %p543_p9, 1, 0 }
  0x11   : > { %p550_p11 = por %p83_p10, %p51_p3  ;;  %s103_s22 = sand.u32 1, %s466_s8  }
  0x12   : > { %s287_s23 = sshll.u32 %s103_s22, 3  ;;  %s298_s24 = sshll.u32 %s474_s10, 7 }
  0x13   : > { %s670_s21 = scalar_select %p550_p11, 1, 0 }
  0x14   : > { %s561_s27 = scalar_lea.hbm %s664_s0, %s298_s24  ;;  %s107_s28 = scalar_lea.vmem [#allocation2], %s287_s23 }
  0x15   : > { %s117_s29 = sshll.u32 %s107_s28, 4  ;;  %p567_p0 = pnand %p312_p13, %p533_p4  ;;  %s563_s29 = int_to_ptr.vmem [resolvable:$true] %s117_s29 }
  0x16   : > { %s104_s2 = scalar_lea.sflag [#allocation3], %s103_s22  ;;  %s366_s3 = scalar_lea.hbm %s561_s27, 128 }
  0x17   : > { %p367_p3 = scmp.ne.s32.totalorder %s561_s27, %s366_s3  ;;  %p368_p5 = pneg %p567_p0 }
  0x18   : > { %s371_s12 = scalar_lea.hbm %s664_s0, 256  ;;  %p372_p4 = scmp.lt.u32.totalorder %s561_s27, %s664_s0 }
  0x19   : > { %p369_p6 = pnand %p368_p5, %p367_p3  ;;  %p373_p10 = scmp.lt.u32.totalorder %s371_s12, %s366_s3 }
  0x1a   : > { %p375_p12 = scmp.lt.u32.totalorder %s366_s3, %s561_s27 }
  0x1b   : > { %p370_p7 = pneg %p369_p6  ;;  %p374_p13 = por %p373_p10, %p372_p4 }
  0x1d   : > { %p376_p1 = por %p375_p12, %p374_p13 }
  0x1f   : > { %p377_p2 = pnand %p376_p1, %p370_p7 }
  0x21   : > { %380 = shalt.err (!%p377_p2)
}
  0x22   : > { %s381_s16 = scalar_lea.vmem %s563_s29, 128  ;;  %s480_s17 = smov [#allocation2]  }
  0x23   : > { %p382_p3 = scmp.ne.s32.totalorder %s563_s29, %s381_s16  ;;  %s386_s22 = sshll.u32 %s480_s17, 4  ;;  %s387_s22 = int_to_ptr.vmem [resolvable:$false] %s386_s22 }
  0x24   : > { %s388_s23 = scalar_lea.vmem %s387_s22, 256  ;;  %p389_p9 = scmp.lt.s32.totalorder %s563_s29, %s387_s22 }
  0x25   : > { %p384_p6 = pnand %p382_p3, %p368_p5  ;;  %p390_p4 = scmp.lt.s32.totalorder %s388_s23, %s381_s16 }
  0x27   : > { %p385_p11 = pneg %p384_p6  ;;  %p391_p10 = por %p390_p4, %p389_p9 }
  0x29   : > { %p392_p12 = pnand %p391_p10, %p385_p11 }
  0x2b   : > { %395 = shalt.err (!%p392_p12)
}
  0x2c   : > { %307 = dma.hbm_to_vmem [thread:$0]  (!%p567_p0), %s561_s27, 128, %s563_s29, %s104_s2  }
  0x2d   : > { %p672_p1 = scmp.lt.s32.totalorder %s478_s11, 3  ;;  %p673_p2 = scmp.ge.s32.totalorder %s478_s11, 1 }
  0x2f   : > { %p123_p5 = pnand %p673_p2, %p672_p1 }
  0x30   : > { %s603_s24 = sand.u32 (!%p123_p5), 1, %s462_s7  }
  0x31   : > { %126 = sbr.rel (%p123_p5) target bundleno = 106 (0x6a), region = 24  ;;  %s291_s25 = sshll.u32 (!%p123_p5), %s603_s24, 3 }
  0x32   : > { %s129_s26 = scalar_lea.sflag (!%p123_p5), [#allocation3], %s603_s24  ;;  %s132_s28 = scalar_lea.vmem (!%p123_p5), [#allocation2], %s291_s25 }
  0x38   : > { %449 = dma.done.wait (%p539_p8), %s129_s26, 128  }
  0x39   : > { %451 = vsyncadd (%p539_p8), %s129_s26, 4294967168  ;;  %v153_v0 = vld [vmem:[%s132_s28] sm:$0xff]  ;;  %vm159_vm0 = vcmask 1043456   ;;  %s150_s18 = scalar_lea.vmem [#allocation5], %s291_s25  ;;  %s299_s29 = sshll.u32 %s470_s9, 7 }
  0x3a   : > { %v154_v1 = vadd.f32 1e-07, %v153_v0  ;;  %s199_s27 = sshll.u32 %s150_s18, 4  ;;  %s617_s3 = scalar_lea.hbm %s665_s1, %s299_s29  ;;  %s612_s27 = int_to_ptr.vmem [resolvable:$true] %s199_s27 }
  0x3b   : > { %s183_s4 = scalar_lea.sflag [#allocation4], %s603_s24  ;;  %s396_s5 = scalar_lea.vmem %s612_s27, 128 }
  0x3c   : > { %v155_v2 = vmul.f32 %v154_v1, %v154_v1  ;;  %p397_p8 = scmp.ne.s32.totalorder %s612_s27, %s396_s5  ;;  %p674_p9 = scmp.ne.s32.totalorder %s669_s19, 0 }
  0x3d   : > { %s481_s9 = smov [#allocation5]  }
  0x3e   : > { %v157_v3 = vcombine.high %v155_v2, %v155_v2  ;;  %v160_v4 = vsel %vm159_vm0, %v155_v2, 0.0  ;;  %p398_p11 = pnand %p397_p8, %p674_p9  ;;  %s400_s12 = sshll.u32 %s481_s9, 4  ;;  %s401_s12 = int_to_ptr.vmem [resolvable:$false] %s400_s12 }
  0x3f   : > { %v161_v5 = vrot.slane %v160_v4, 4  ;;  %s402_s13 = scalar_lea.vmem %s401_s12, 256  ;;  %p403_p7 = scmp.lt.s32.totalorder %s612_s27, %s401_s12 }
  0x40   : > { %v167_v6 = vsel %vm159_vm0, %v157_v3, 0.0  ;;  %p399_p0 = pneg %p398_p11  ;;  %p404_p13 = scmp.lt.s32.totalorder %s402_s13, %s396_s5 }
  0x41   : > { %v162_v7 = vadd.f32 %v161_v5, %v160_v4  ;;  %v168_v8 = vrot.slane %v167_v6, 4 }
  0x42   : > { %p405_p3 = por %p404_p13, %p403_p7 }
  0x43   : > { %v163_v9 = vrot.slane %v162_v7, 2  ;;  %v169_v10 = vadd.f32 %v168_v8, %v167_v6 }
  0x44   : > { %p406_p6 = pnand %p405_p3, %p399_p0 }
  0x45   : > { %v164_v11 = vadd.f32 %v163_v9, %v162_v7  ;;  %v170_v12 = vrot.slane %v169_v10, 2 }
  0x47   : > { %v165_v13 = vrot.slane %v164_v11, 1  ;;  %v171_v14 = vadd.f32 %v170_v12, %v169_v10 }
  0x49   : > { %v166_v15 = vadd.f32 %v165_v13, %v164_v11  ;;  %v172_v16 = vrot.slane %v171_v14, 1 }
  0x4b   : > { %v173_v17 = vadd.f32 %v172_v16, %v171_v14  ;;  %362 = vrsqrt.f32 %v166_v15 }
  0x4d   : > { %364 = vrsqrt.f32 %v173_v17 }
  0x55   : > { %v363_v18 = vpop.eup %362 }
  0x57   : > { %v365_v19 = vpop.eup %364 }
  0x58   : > { %v178_v20 = vcombine.low %v363_v18, %v365_v19 }
  0x5a   : > { %v180_v21 = vmul.f32 %v178_v20, %v153_v0 }
  0x5c   : > { %181 = vst [vmem:[%s150_s18] sm:$0xff] %v180_v21 }
  0x5d   : > { %409 = shalt.err (!%p406_p6)
}
  0x5e   : > { %s410_s15 = scalar_lea.hbm %s617_s3, 128  ;;  %s414_s22 = scalar_lea.hbm %s665_s1, 256 }
  0x5f   : > { %p411_p4 = scmp.ne.s32.totalorder %s617_s3, %s410_s15  ;;  %p415_p1 = scmp.lt.u32.totalorder %s617_s3, %s665_s1 }
  0x60   : > { %p416_p2 = scmp.lt.u32.totalorder %s414_s22, %s410_s15  ;;  %p418_p8 = scmp.lt.u32.totalorder %s410_s15, %s617_s3 }
  0x61   : > { %p412_p10 = pnand %p411_p4, %p674_p9 }
  0x62   : > { %p417_p5 = por %p416_p2, %p415_p1 }
  0x63   : > { %p413_p12 = pneg %p412_p10 }
  0x64   : > { %p419_p11 = por %p418_p8, %p417_p5 }
  0x66   : > { %p420_p0 = pnand %p419_p11, %p413_p12 }
  0x68   : > { %423 = shalt.err (!%p420_p0)
}
  0x69   : > { %302 = dma.vmem_to_hbm [thread:$0]  (%p674_p9), %s612_s27, 128, %s617_s3, %s183_s4  }
  0x6a PF: > { %s211_s25 = sand.u32 1, %s458_s6   ;;  %p675_p7 = scmp.ne.s32.totalorder %s670_s21, 0 }
  0x6b   : > { %p676_p13 = scmp.ge.s32.totalorder %s478_s11, 2  ;;  %s212_s26 = scalar_lea.sflag [#allocation4], %s211_s25 }
  0x6d   : > { %p309_p3 = pnand %p676_p13, %p675_p7 }
  0x6f   : > { %453 = dma.done.wait (!%p309_p3), %s212_s26, 128  }
  0x70   : > { %455 = vsyncadd (!%p309_p3), %s212_s26, 4294967168  ;;  %s17_s11 = sadd.s32 1, %s478_s11   ;;  %s677_s6 = smov %s462_s7 }
  0x71   : > { %p14_p6 = scmp.ge.s32.totalorder %s17_s11, 4   ;;  %s678_s7 = smov %s466_s8 }
  0x72   : > { %s679_s8 = smov %s548_s20  ;;  %s680_s9 = smov %s474_s10 }
  0x73   : > { %s681_s10 = smov %s683_s14  ;;  %16 = sbr.rel (!%p14_p6) target bundleno = 6 (0x6), region = 69 }
  0x7a   :  { %217 = vsyncpa [#allocation3], 1 }
  0x7b   :  { %219 = vsyncpa [#allocation3 + $0x1], 1 }
  0x7c   :  { %220 = vsyncpa [#allocation4], 1 }
  0x7d   :  { %222 = vsyncpa [#allocation4 + $0x1], 1 }

</bundles_post_ra>
